<compile_context>
chip_gen: v7x
topology: tpu7x:2x2x1
jax: 0.10.0
libtpu: 0.0.40
codegen_flags: <defaults>
</compile_context>

<pallas_src>
import math

import jax
import jax.numpy as jnp
from jax.experimental import pallas as pl
from jax.experimental.pallas import tpu as pltpu

_LANES = 128                       # TPU lane width; fixed cols for the 2-D slab
_TILE_CAP_BYTES = 4 * 1024 * 1024  # 4 MiB tiles reach ~85% HBM roofline on all gens
_MIN_GRID_STEPS = 4                # keep >=4 blocks so the pipeline (and v7x TCs) stay busy
_HEADROOM_BYTES = 4 * 1024 * 1024  # scratch headroom on top of the double-buffered working set


def _identity_kernel(x_ref, o_ref):
    # Pure streaming copy: tile goes HBM -> VMEM -> HBM (aliased output).
    o_ref[...] = x_ref[...]


def _vmem_capacity_bytes() -> int:
    try:
        return int(pltpu.get_tpu_info().vmem_capacity_bytes)
    except Exception:  # conservative fallback == v7x per-TC VMEM (smallest)
        return 64 * 1024 * 1024


def _choose_block_rows(rows: int, itemsize: int):
    """Pick block_rows (<= ~4 MiB tile, >= _MIN_GRID_STEPS blocks) + a vmem limit."""
    # Sublane packing: 8 rows f32, 16 rows bf16, 32 rows int8/fp8.
    row_align = 8 * max(1, 4 // max(1, itemsize))
    bytes_per_row = _LANES * itemsize

    vmem_cap = _vmem_capacity_bytes()
    # Working set is 2 pipeline buffers x (in + out) x tile; keep
    # 4*tile + headroom <= 0.75 * physical VMEM on every generation.
    tile_budget = min(_TILE_CAP_BYTES,
                      max(bytes_per_row,
                          (int(0.75 * vmem_cap) - _HEADROOM_BYTES) // 4))
    max_block_rows = max(row_align,
                         (tile_budget // bytes_per_row) // row_align * row_align)

    if rows <= row_align:
        # Tiny slab: a single full-extent block is the only legal (and sane) choice.
        block_rows = rows
    else:
        # Aim for >= _MIN_GRID_STEPS grid steps so DMA-in/compute/DMA-out overlap
        # and the 'parallel' axis can shard across both v7x TensorCores.
        target = max(1, pl.cdiv(rows, _MIN_GRID_STEPS))
        block_rows = min(max_block_rows, target, rows)
        block_rows = max(row_align, (block_rows // row_align) * row_align)
        if block_rows >= rows:
            block_rows = rows  # full extent is always legal

    tile_bytes = block_rows * bytes_per_row
    # Scoped limit = working set + headroom (>= 16 MiB, <= 0.8 * physical VMEM).
    vmem_limit = int(min(int(0.8 * vmem_cap),
                         max(16 * 1024 * 1024, 4 * tile_bytes + _HEADROOM_BYTES)))
    return block_rows, vmem_limit


def _pallas_identity_copy(x: jax.Array) -> jax.Array:
    """Explicit Pallas streaming copy of x (used only when force_copy=True)."""
    orig_shape = x.shape
    n = int(math.prod(orig_shape)) if orig_shape else 1
    if n == 0:
        return x

    n_tail = n % _LANES
    n_bulk = n - n_tail
    if n_bulk == 0:
        # Fewer than 128 elements: nothing worth streaming through a kernel.
        return x

    flat = x.reshape((n,))
    bulk = flat if n_tail == 0 else flat[:n_bulk]

    rows = n_bulk // _LANES
    block_rows, vmem_limit = _choose_block_rows(rows, x.dtype.itemsize)
    x2 = bulk.reshape((rows, _LANES))

    y2 = pl.pallas_call(
        _identity_kernel,
        out_shape=jax.ShapeDtypeStruct((rows, _LANES), x.dtype),
        grid=(pl.cdiv(rows, block_rows),),   # tail block (if any) is masked by Pallas
        in_specs=[pl.BlockSpec((block_rows, _LANES), lambda i: (i, 0))],
        out_specs=pl.BlockSpec((block_rows, _LANES), lambda i: (i, 0)),
        # Alias input 0 <-> output 0: no second HBM buffer when the input is donated.
        input_output_aliases={0: 0},
        compiler_params=pltpu.CompilerParams(
            dimension_semantics=("parallel",),   # shards blocks across TCs on v7x
            vmem_limit_bytes=vmem_limit,
        ),
    )(x2)

    if n_tail == 0:
        return y2.reshape(orig_shape)
    # <128-element tail is carried through untouched — no full-array pad/slice.
    return jnp.concatenate([y2.reshape((n_bulk,)), flat[n_bulk:]]).reshape(orig_shape)


def mrdict_forward(x: jax.Array, force_copy: bool = False) -> jax.Array:
    """Forward for MrDict: identity.

    Default is a zero-cost pass-through (the review's dominant win); set
    force_copy=True to route the data through the tuned Pallas copy kernel.
    """
    if not force_copy:
        return x
    return _pallas_identity_copy(x)


if __name__ == "__main__":
    key = jax.random.PRNGKey(0)

    # Deterministic example input: batch=2, channels=4, spatial=16x16 (2048 elems).
    x = jax.random.normal(key, (2, 4, 16, 16), dtype=jnp.float32)
    expected = jnp.array(x, copy=True)   # pristine copy (kernel input may be aliased)

    # Zero-cost default path.
    y0 = mrdict_forward(x)
    assert y0.shape == expected.shape and y0.dtype == expected.dtype
    assert bool(jnp.allclose(y0, expected)), "identity (pass-through) mismatch"

    # Explicit Pallas streaming-copy path (128-aligned: rows=16, block_rows=8, grid=2).
    y = jax.block_until_ready(mrdict_forward(x, force_copy=True))
    assert y.shape == expected.shape and y.dtype == expected.dtype
    assert bool(jnp.allclose(y, expected)), "identity (pallas copy) mismatch"

    # Ragged size with an aligned bulk + small tail (5*7*9 = 315 = 256 + 59).
    xr = jax.random.normal(jax.random.PRNGKey(1), (5, 7, 9), dtype=jnp.float32)
    expected_r = jnp.array(xr, copy=True)
    yr = jax.block_until_ready(mrdict_forward(xr, force_copy=True))
    assert yr.shape == expected_r.shape and yr.dtype == expected_r.dtype
    assert bool(jnp.allclose(yr, expected_r)), "ragged identity (pallas copy) mismatch"

    # Tiny ragged size (<128 elems): short-circuits, no kernel launch.
    xt = jax.random.normal(jax.random.PRNGKey(2), (3, 5, 7), dtype=jnp.float32)
    yt = jax.block_until_ready(mrdict_forward(xt, force_copy=True))
    assert bool(jnp.allclose(yt, xt)), "tiny identity mismatch"

    print("KERNEL_OK")
</pallas_src>

<mosaic_0001>
module attributes {stable_mosaic.version = 11 : i64} {
  func.func @_identity_kernel(%arg0: i32, %arg1: memref<8x128xf32, #tpu.memory_space<vmem>>, %arg2: memref<8x128xf32, #tpu.memory_space<vmem>>) attributes {dimension_semantics = [#tpu.dimension_semantics<parallel>], iteration_bounds = array<i64: 2>, scalar_prefetch = 0 : i64, scratch_operands = 0 : i64, tpu.core_type = #tpu.core_type<tc>, window_params = [{transform_indices = @transform_0, window_bounds = array<i64: 8, 128>}, {transform_indices = @transform_1, window_bounds = array<i64: 8, 128>}]} {
    %c0 = arith.constant 0 : index
    %c0_0 = arith.constant 0 : index
    %0 = vector.load %arg1[%c0, %c0_0] : memref<8x128xf32, #tpu.memory_space<vmem>>, vector<8x128xf32>
    %c0_1 = arith.constant 0 : index
    %c0_2 = arith.constant 0 : index
    %1 = vector.load %arg2[%c0_1, %c0_2] : memref<8x128xf32, #tpu.memory_space<vmem>>, vector<8x128xf32>
    tpu.vector_store %arg2[%c0_1, %c0_2], %0 {strides = array<i32>} : memref<8x128xf32, #tpu.memory_space<vmem>>, vector<8x128xf32>,
    return
  }
  func.func @transform_0(%arg0: i32) -> (i32, i32) {
    %c0_i32 = arith.constant 0 : i32
    %c0_i32_0 = arith.constant 0 : i32
    return %arg0, %c0_i32 : i32, i32
  }
  func.func @transform_1(%arg0: i32) -> (i32, i32) {
    %c0_i32 = arith.constant 0 : i32
    %c0_i32_0 = arith.constant 0 : i32
    return %arg0, %c0_i32 : i32, i32
  }
}

</mosaic_0001>

<bundles_post_ra>
// kernel: tpu_custom_call.1
= control target key start
LH: loop header
LB: loop body
LE: loop exit
PB: predicated region body
PF: predicated region fallthrough
CT: control target
= control target key end

     0   :  { %6 = vsyncpa [#allocation3], 0  ;;  %s547_s0 = inlined_call_operand.hbm [shape: f32[16,128], index: 0, kind: input, shape index: {}, may-alias: {0,1}]   ;;  %s548_s1 = inlined_call_operand.hbm [shape: f32[16,128], index: 1, kind: output, shape index: {}, may-alias: {0,1}]  }
   0x1   :  { %8 = vsyncpa [#allocation3 + $0x1], 0 }
   0x2   :  { %9 = vsyncpa [#allocation4], 0 }
   0x3   :  { %11 = vsyncpa [#allocation4 + $0x1], 0  ;;  %s386_s6 = smov 0   ;;  %s388_s7 = smov 0  }
   0x4   :  { %s390_s8 = smov 0   ;;  %s392_s9 = smov 0  }
   0x5 LB: > { %s407_s10 = sadd.s32 4294967295, %s372_s9   ;;  %s218_s11 = sadd.s32 4294967294, %s372_s9   ;;  %s372_s9 = sphi %s392_s9, %s563_s9   ;;  %s368_s8 = sphi %s390_s8, %s562_s8   ;;  %s364_s7 = sphi %s388_s7, %s561_s7   ;;  %s360_s6 = sphi %s386_s6, %s560_s6  }
   0x6   : > { %s411_s12 = sadd.s32 1, %s372_s9   ;;  %s24_s13 = sadd.s32 1, %s368_s8 }
   0x7   : > { %s21_s14 = ssub.s32 %s372_s9, %s411_s12  ;;  %p31_p0 = scmp.ne.s32.totalorder %s368_s8, %s364_s7 }
   0x8   : > { %p22_p1 = scmp.eq.s32.totalorder %s21_s14, 0  ;;  %p32_p2 = scmp.eq.s32.totalorder %s372_s9, 0 }
   0x9   : > { %p37_p3 = scmp.ne.s32.totalorder %s364_s7, %s360_s6  ;;  %p38_p4 = scmp.eq.s32.totalorder %s407_s10, 0 }
   0xa   : > { %s423_s15 = scalar_select %p22_p1, %s368_s8, %s24_s13  }
   0xb   : > { %p425_p5 = por %p32_p2, %p31_p0  ;;  %p429_p6 = por %p38_p4, %p37_p3 }
   0xc   : > { %p61_p7 = scmp.eq.s32.totalorder %s407_s10, 1  ;;  %p67_p8 = scmp.eq.s32.totalorder %s218_s11, 1 }
   0xd   : > { %p242_p10 = scmp.lt.s32.totalorder %s372_s9, 2  ;;  %s87_s20 = sand.u32 1, %s368_s8  }
   0xe   : > { %p436_p11 = por %p61_p7, %p31_p0  ;;  %p440_p12 = por %p67_p8, %p37_p3 }
   0xf   : > { %s222_s21 = sshll.u32 %s372_s9, 7  ;;  %s221_s22 = sshll.u32 %s87_s20, 3 }
  0x10   : > { %s552_s18 = scalar_select %p436_p11, 1, 0 }
  0x11   : > { %s553_s19 = scalar_select %p440_p12, 1, 0 }
  0x12   : > { %s449_s25 = scalar_lea.hbm %s547_s0, %s222_s21  ;;  %s91_s26 = scalar_lea.vmem [#allocation2], %s221_s22 }
  0x13   : > { %s98_s27 = sshll.u32 %s91_s26, 4  ;;  %p453_p13 = pnand %p242_p10, %p425_p5  ;;  %s457_s27 = int_to_ptr.vmem [resolvable:$true] %s98_s27 }
  0x14   : > { %s88_s29 = scalar_lea.sflag [#allocation3], %s87_s20  ;;  %s276_s30 = scalar_lea.hbm %s449_s25, 128 }
  0x15   : > { %p277_p2 = scmp.ne.s32.totalorder %s449_s25, %s276_s30  ;;  %p278_p3 = pneg %p453_p13 }
  0x16   : > { %s281_s4 = scalar_lea.hbm %s547_s0, 256  ;;  %p282_p5 = scmp.lt.u32.totalorder %s449_s25, %s547_s0 }
  0x17   : > { %p279_p4 = pnand %p278_p3, %p277_p2  ;;  %p283_p8 = scmp.lt.u32.totalorder %s281_s4, %s276_s30 }
  0x18   : > { %p285_p9 = scmp.lt.u32.totalorder %s276_s30, %s449_s25 }
  0x19   : > { %p280_p7 = pneg %p279_p4  ;;  %p284_p10 = por %p283_p8, %p282_p5 }
  0x1b   : > { %p286_p0 = por %p285_p9, %p284_p10 }
  0x1d   : > { %p287_p1 = pnand %p286_p0, %p280_p7 }
  0x1f   : > { %290 = shalt.err (!%p287_p1)
}
  0x20   : > { %s291_s13 = scalar_lea.vmem %s457_s27, 128  ;;  %s374_s14 = smov [#allocation2]  }
  0x21   : > { %p292_p2 = scmp.ne.s32.totalorder %s457_s27, %s291_s13  ;;  %s296_s16 = sshll.u32 %s374_s14, 4  ;;  %s297_s16 = int_to_ptr.vmem [resolvable:$false] %s296_s16 }
  0x22   : > { %s298_s20 = scalar_lea.vmem %s297_s16, 256  ;;  %p299_p11 = scmp.lt.s32.totalorder %s457_s27, %s297_s16 }
  0x23   : > { %p294_p4 = pnand %p292_p2, %p278_p3  ;;  %p300_p5 = scmp.lt.s32.totalorder %s298_s20, %s291_s13 }
  0x25   : > { %p295_p12 = pneg %p294_p4  ;;  %p301_p8 = por %p300_p5, %p299_p11 }
  0x27   : > { %p302_p9 = pnand %p301_p8, %p295_p12 }
  0x29   : > { %305 = shalt.err (!%p302_p9)
}
  0x2a   : > { %237 = dma.hbm_to_vmem [thread:$0]  (!%p453_p13), %s449_s25, 128, %s457_s27, %s88_s29  }
  0x2b   : > { %p555_p0 = scmp.lt.s32.totalorder %s372_s9, 3  ;;  %p556_p1 = scmp.ge.s32.totalorder %s372_s9, 1 }
  0x2d   : > { %p104_p3 = pnand %p556_p1, %p555_p0 }
  0x2e   : > { %s491_s21 = sand.u32 (!%p104_p3), 1, %s364_s7  }
  0x2f   : > { %107 = sbr.rel (%p104_p3) target bundleno = 81 (0x51), region = 24  ;;  %s224_s22 = sshll.u32 (!%p104_p3), %s491_s21, 3 }
  0x30   : > { %s110_s23 = scalar_lea.sflag (!%p104_p3), [#allocation3], %s491_s21  ;;  %s113_s24 = scalar_lea.vmem (!%p104_p3), [#allocation2], %s224_s22 }
  0x36   : > { %351 = dma.done.wait (%p429_p6), %s110_s23, 128  }
  0x37   : > { %353 = vsyncadd (%p429_p6), %s110_s23, 4294967168  ;;  %s131_s25 = scalar_lea.vmem [#allocation5], %s224_s22  ;;  %s227_s27 = sshll.u32 %s407_s10, 7  ;;  %v132_v0 = vld [vmem:[%s113_s24] sm:$0xff] }
  0x38   : > { %s148_s26 = sshll.u32 %s131_s25, 4  ;;  %s505_s30 = scalar_lea.hbm %s548_s1, %s227_s27  ;;  %133 = vst [vmem:[%s131_s25] sm:$0xff] %v132_v0  ;;  %s500_s26 = int_to_ptr.vmem [resolvable:$true] %s148_s26 }
  0x39   : > { %s135_s17 = scalar_lea.sflag [#allocation4], %s491_s21  ;;  %s306_s2 = scalar_lea.vmem %s500_s26, 128 }
  0x3a   : > { %p307_p6 = scmp.ne.s32.totalorder %s500_s26, %s306_s2  ;;  %p557_p11 = scmp.ne.s32.totalorder %s552_s18, 0 }
  0x3b   : > { %s375_s3 = smov [#allocation5]  }
  0x3c   : > { %p308_p12 = pnand %p307_p6, %p557_p11  ;;  %s310_s10 = sshll.u32 %s375_s3, 4  ;;  %s311_s10 = int_to_ptr.vmem [resolvable:$false] %s310_s10 }
  0x3d   : > { %s312_s4 = scalar_lea.vmem %s311_s10, 256  ;;  %p313_p7 = scmp.lt.s32.totalorder %s500_s26, %s311_s10 }
  0x3e   : > { %p309_p13 = pneg %p308_p12  ;;  %p314_p10 = scmp.lt.s32.totalorder %s312_s4, %s306_s2 }
  0x40   : > { %p315_p2 = por %p314_p10, %p313_p7 }
  0x42   : > { %p316_p4 = pnand %p315_p2, %p309_p13 }
  0x44   : > { %319 = shalt.err (!%p316_p4)
}
  0x45   : > { %s320_s5 = scalar_lea.hbm %s505_s30, 128  ;;  %s324_s14 = scalar_lea.hbm %s548_s1, 256 }
  0x46   : > { %p321_p5 = scmp.ne.s32.totalorder %s505_s30, %s320_s5  ;;  %p325_p0 = scmp.lt.u32.totalorder %s505_s30, %s548_s1 }
  0x47   : > { %p326_p1 = scmp.lt.u32.totalorder %s324_s14, %s320_s5  ;;  %p328_p6 = scmp.lt.u32.totalorder %s320_s5, %s505_s30 }
  0x48   : > { %p322_p8 = pnand %p321_p5, %p557_p11 }
  0x49   : > { %p327_p3 = por %p326_p1, %p325_p0 }
  0x4a   : > { %p323_p9 = pneg %p322_p8 }
  0x4b   : > { %p329_p12 = por %p328_p6, %p327_p3 }
  0x4d   : > { %p330_p13 = pnand %p329_p12, %p323_p9 }
  0x4f   : > { %333 = shalt.err (!%p330_p13)
}
  0x50   : > { %232 = dma.vmem_to_hbm [thread:$0]  (%p557_p11), %s500_s26, 128, %s505_s30, %s135_s17  }
  0x51 PF: > { %s160_s21 = sand.u32 1, %s360_s6   ;;  %p558_p7 = scmp.ne.s32.totalorder %s553_s19, 0 }
  0x52   : > { %p559_p10 = scmp.ge.s32.totalorder %s372_s9, 2  ;;  %s161_s22 = scalar_lea.sflag [#allocation4], %s160_s21 }
  0x54   : > { %p239_p2 = pnand %p559_p10, %p558_p7 }
  0x56   : > { %355 = dma.done.wait (!%p239_p2), %s161_s22, 128  }
  0x57   : > { %357 = vsyncadd (!%p239_p2), %s161_s22, 4294967168  ;;  %p14_p4 = scmp.ge.s32.totalorder %s411_s12, 4   ;;  %s560_s6 = smov %s364_s7 }
  0x58   : > { %s561_s7 = smov %s368_s8  ;;  %s562_s8 = smov %s423_s15 }
  0x59   : > { %s563_s9 = smov %s411_s12  ;;  %16 = sbr.rel (!%p14_p4) target bundleno = 5 (0x5), region = 69 }
  0x60   :  { %166 = vsyncpa [#allocation3], 1 }
  0x61   :  { %168 = vsyncpa [#allocation3 + $0x1], 1 }
  0x62   :  { %169 = vsyncpa [#allocation4], 1 }
  0x63   :  { %171 = vsyncpa [#allocation4 + $0x1], 1 }

</bundles_post_ra>
